<compile_context>
chip_gen: v5e
topology: v5e:2x2
jax: 0.10.0
libtpu: 0.0.40
codegen_flags: <defaults>
</compile_context>

<pallas_src>
import jax
import jax.numpy as jnp
from jax.experimental import pallas as pl
from jax.experimental.pallas import tpu as pltpu

SMOOTH = 1e-05
LANE = 128
_TARGET_TILE_BYTES = 2 * 1024 * 1024     # ~2 MiB of predict per grid step
_MAX_TILE_ROWS = 4096                    # hard cap: 512K pixels per tile
_VREG_BUDGET = 40                        # live (8,128)-f32 vregs per chunk


def _cdiv(a, b):
    return -(-a // b)


def _round_up(a, b):
    return _cdiv(a, b) * b


def _num_tensorcores():
    """Best-effort TensorCore count of the local chip (1 if unknown)."""
    try:
        info = pltpu.get_tpu_info()
    except Exception:
        return 1
    for name in ("num_cores", "num_tensorcores", "tensorcore_count",
                 "cores_per_chip", "core_count"):
        v = getattr(info, name, None)
        if isinstance(v, int) and v > 0:
            return v
    return 1


def _make_dice_kernel(C, tile_r, acc_r, c_rows, n_full, rem):
    """Kernel over one (1, C, tile_r, 128) logits tile.

    The body walks chunks of `c_rows` sublane-rows, computes the channel
    softmax + dice integrands for the chunk, folds them into vreg-resident
    (C, acc_r, 128) partials, and adds the partials to the resident output
    block once per grid step.
    """

    def fold_rows(x, rows):
        # (C, rows, 128) -> (C, acc_r, 128) with pure elementwise VPU adds
        n_grp = rows // acc_r
        tail = rows - n_grp * acc_r
        acc = None
        if n_grp:
            acc = x[:, :acc_r, :]
            for g in range(1, n_grp):
                acc = acc + x[:, g * acc_r:(g + 1) * acc_r, :]
        if tail:  # only reachable for odd single-tile shapes (wrapper avoids it)
            part = jnp.concatenate(
                [x[:, n_grp * acc_r:, :],
                 jnp.zeros((C, acc_r - tail, LANE), jnp.float32)], axis=1)
            acc = part if acc is None else acc + part
        return acc

    def kernel(p_ref, t_ref, inter_ref, union_ref):
        # p_ref:     (1, C, tile_r, 128)   logits tile (native dtype)
        # t_ref:     (1, 1, tile_r, 128)   class-index tile (native int dtype)
        # inter_ref: (1, C, acc_r, 128)    lane/sublane-dense accumulator
        # union_ref: (1, C, acc_r, 128)    (resident across the inner axis)
        s = pl.program_id(2)

        @pl.when(s == 0)
        def _():
            inter_ref[...] = jnp.zeros_like(inter_ref)
            union_ref[...] = jnp.zeros_like(union_ref)

        def chunk_partials(start, rows):
            # channel = plane axis; (rows, 128) = (sublane, lane): full occupancy
            logits = p_ref[0, :, pl.ds(start, rows), :].astype(jnp.float32)
            tgt = t_ref[0, 0, pl.ds(start, rows), :].astype(jnp.int32)

            # softmax over the channel (plane) axis: elementwise max/exp/add
            m = jnp.max(logits, axis=0, keepdims=True)
            e = jnp.exp(logits - m)
            inv = pl.reciprocal(jnp.sum(e, axis=0, keepdims=True), approx=True)
            p = e * inv                                       # (C, rows, 128)

            # one-hot(target) via select (no int->f32 cast, no extra multiply)
            ch = jax.lax.broadcasted_iota(jnp.int32, (C, rows, LANE), 0)
            is_c = ch == tgt[None]
            prod = jnp.where(is_c, p, 0.0)                    # p * onehot
            u = p * p + jnp.where(is_c, 1.0, 0.0)             # p^2 + onehot
            return fold_rows(prod, rows), fold_rows(u, rows)

        zero = jnp.zeros((C, acc_r, LANE), jnp.float32)
        if n_full == 0:
            ip, up = zero, zero
        elif n_full == 1:
            ip, up = chunk_partials(0, c_rows)
        else:
            def body(j, carry):
                ci, cu = carry
                start = pl.multiple_of(j * c_rows, c_rows)
                a, b = chunk_partials(start, c_rows)
                return ci + a, cu + b
            ip, up = jax.lax.fori_loop(0, n_full, body, (zero, zero),
                                       unroll=min(n_full, 8))
        if rem:
            a, b = chunk_partials(n_full * c_rows, rem)
            ip, up = ip + a, up + b

        inter_ref[...] += ip[None]
        union_ref[...] += up[None]

    return kernel


def dice_loss(predict, target):
    """predict: (N, C, ...) float logits; target: (N, 1, ...) integer class ids."""
    N, C = predict.shape[:2]
    S = 1
    for d in predict.shape[2:]:
        S *= d

    p = predict.reshape(N, C, S)          # native dtype: bf16 stays bf16 in HBM
    t = target.reshape(N, 1, S)
    if not jnp.issubdtype(t.dtype, jnp.integer):
        t = t.astype(jnp.int32)           # otherwise keep the caller's int dtype

    p_bytes = jnp.dtype(p.dtype).itemsize

    # ---- spatial tiling over the (N, C, R, 128) layout ----
    R = _cdiv(S, LANE)
    cores = _num_tensorcores()
    if R <= 8:
        n_sp, tile_r = 1, R
    else:
        bytes_per_row = C * LANE * p_bytes
        t_rows = max(8, min(_MAX_TILE_ROWS,
                            (_TARGET_TILE_BYTES // bytes_per_row) // 8 * 8))
        n_sp = _cdiv(R, t_rows)
        if N == 1 and R >= 16:
            n_sp = max(n_sp, 2)           # pipelining / 2nd TensorCore when N==1
            if cores >= 2 and n_sp % 2:
                n_sp += 1
        tile_r = _round_up(_cdiv(R, n_sp), 8)
    R_pad = n_sp * tile_r
    acc_r = 8 if tile_r >= 8 else tile_r

    n_outer = 2 if (N == 1 and cores >= 2 and n_sp >= 2 and n_sp % 2 == 0) else 1
    n_inner = n_sp // n_outer

    # Pad (only when the flat spatial size is not already tile-aligned): padded
    # pixels get zero logits and an out-of-range class id, so they contribute
    # exactly 0 to the intersection and exactly 1/C^2 per class to the union,
    # which is subtracted analytically in the glue (no per-step mask in-kernel).
    n_pad = R_pad * LANE - S
    if n_pad:
        if C > jnp.iinfo(t.dtype).max:
            t = t.astype(jnp.int32)
        p = jnp.pad(p, ((0, 0), (0, 0), (0, n_pad)))
        t = jnp.pad(t, ((0, 0), (0, 0), (0, n_pad)), constant_values=C)
    p4 = p.reshape(N, C, R_pad, LANE)
    t4 = t.reshape(N, 1, R_pad, LANE)
    t_bytes = jnp.dtype(t4.dtype).itemsize

    # in-kernel chunk size (sublane rows), sized so chunk temporaries stay in vregs
    if tile_r < 8:
        c_rows = tile_r
    else:
        groups = max(1, _VREG_BUDGET // (3 * C + 4))
        c_rows = max(8, min(32, groups * 8))
    n_full, rem = tile_r // c_rows, tile_r % c_rows

    kernel = _make_dice_kernel(C, tile_r, acc_r, c_rows, n_full, rem)

    cost = pl.CostEstimate(
        flops=12 * N * C * R_pad * LANE,
        transcendentals=N * (C + 1) * R_pad * LANE,
        bytes_accessed=N * R_pad * LANE * (C * p_bytes + t_bytes)
                       + 2 * N * n_outer * C * acc_r * LANE * 4,
    )

    inter, union = pl.pallas_call(
        kernel,
        out_shape=(
            jax.ShapeDtypeStruct((N, n_outer * C, acc_r, LANE), jnp.float32),
            jax.ShapeDtypeStruct((N, n_outer * C, acc_r, LANE), jnp.float32),
        ),
        grid_spec=pltpu.PrefetchScalarGridSpec(
            num_scalar_prefetch=0,
            grid=(N, n_outer, n_inner),
            in_specs=[
                pl.BlockSpec((1, C, tile_r, LANE),
                             lambda n, v, s: (n, 0, v * n_inner + s, 0)),
                pl.BlockSpec((1, 1, tile_r, LANE),
                             lambda n, v, s: (n, 0, v * n_inner + s, 0)),
            ],
            out_specs=[
                pl.BlockSpec((1, C, acc_r, LANE), lambda n, v, s: (n, v, 0, 0)),
                pl.BlockSpec((1, C, acc_r, LANE), lambda n, v, s: (n, v, 0, 0)),
            ],
        ),
        compiler_params=pltpu.CompilerParams(
            dimension_semantics=("parallel", "parallel", "arbitrary"),
            vmem_limit_bytes=32 * 1024 * 1024,
        ),
        cost_estimate=cost,
    )(p4, t4)

    # tiny finalization in plain JAX: collapse the outer split + sublanes/lanes
    inter_nc = inter.reshape(N, n_outer, C, acc_r * LANE).sum(axis=(1, 3))
    union_nc = union.reshape(N, n_outer, C, acc_r * LANE).sum(axis=(1, 3))
    if n_pad:
        union_nc = union_nc - jnp.float32(n_pad) / (C * C)
    dice_coef = (2.0 * inter_nc + SMOOTH) / (union_nc + SMOOTH)
    # module constructed with weight=None -> no class weighting
    return 1.0 - jnp.mean(dice_coef)


def _dice_loss_ref(predict, target):
    """Pure-JAX reference mirroring the PyTorch forward."""
    N, C = predict.shape[:2]
    p = predict.reshape(N, C, -1).astype(jnp.float32)
    t = target.reshape(N, -1).astype(jnp.int32)
    p = jax.nn.softmax(p, axis=1)
    onehot = jax.nn.one_hot(t, C, dtype=jnp.float32).transpose(0, 2, 1)  # (N,C,S)
    inter = jnp.sum(p * onehot, axis=2)
    union = jnp.sum(p * p, axis=2) + jnp.sum(onehot, axis=2)
    dice_coef = (2.0 * inter + SMOOTH) / (union + SMOOTH)
    return 1.0 - jnp.mean(dice_coef)


if __name__ == "__main__":
    # case 1: nominal small shape (batch=2, C=4, 16x16), f32 logits
    kp, kt = jax.random.split(jax.random.PRNGKey(0))
    predict = jax.random.normal(kp, (2, 4, 16, 16), dtype=jnp.float32)
    target = jax.random.randint(kt, (2, 1, 16, 16), 0, 4, dtype=jnp.int32)
    loss = jax.block_until_ready(dice_loss(predict, target))
    loss_ref = jax.block_until_ready(_dice_loss_ref(predict, target))
    # tolerance 1e-3: softmax denominator uses the EUP approximate reciprocal
    assert jnp.abs(loss - loss_ref) < 1e-3, (loss, loss_ref)

    # case 2: batch=1, bf16 logits, spatial size not a multiple of 128 ->
    # exercises the out-of-range-class pad + exact analytic union correction
    kp2, kt2 = jax.random.split(jax.random.PRNGKey(1))
    predict2 = jax.random.normal(kp2, (1, 3, 20, 20), dtype=jnp.bfloat16)
    target2 = jax.random.randint(kt2, (1, 1, 20, 20), 0, 3, dtype=jnp.int32)
    loss2 = jax.block_until_ready(dice_loss(predict2, target2))
    loss2_ref = jax.block_until_ready(_dice_loss_ref(predict2, target2))
    assert jnp.abs(loss2 - loss2_ref) < 1e-3, (loss2, loss2_ref)

    print("KERNEL_OK")
</pallas_src>

<mosaic_0001>
module attributes {stable_mosaic.version = 11 : i64} {
  func.func @kernel(%arg0: i32, %arg1: i32, %arg2: i32, %arg3: memref<1x4x2x128xf32, #tpu.memory_space<vmem>>, %arg4: memref<1x1x2x128xi32, #tpu.memory_space<vmem>>, %arg5: memref<1x4x2x128xf32, #tpu.memory_space<vmem>>, %arg6: memref<1x4x2x128xf32, #tpu.memory_space<vmem>>) attributes {dimension_semantics = [#tpu.dimension_semantics<parallel>, #tpu.dimension_semantics<parallel>, #tpu.dimension_semantics<arbitrary>], iteration_bounds = array<i64: 2, 1, 1>, scalar_prefetch = 0 : i64, scratch_operands = 0 : i64, tpu.core_type = #tpu.core_type<tc>, window_params = [{transform_indices = @transform_0, window_bounds = array<i64: 1, 4, 2, 128>}, {transform_indices = @transform_1, window_bounds = array<i64: 1, 1, 2, 128>}, {transform_indices = @transform_2, window_bounds = array<i64: 1, 4, 2, 128>}, {transform_indices = @transform_3, window_bounds = array<i64: 1, 4, 2, 128>}]} {
    %c0_i32 = arith.constant 0 : i32
    %0 = arith.cmpi eq, %arg2, %c0_i32 : i32
    %1 = arith.extui %0 : i1 to i32
    %c0_i32_0 = arith.constant 0 : i32
    %2 = arith.cmpi ne, %1, %c0_i32_0 : i32
    scf.if %2 {
      %cst_28 = arith.constant 0.000000e+00 : f32
      %36 = vector.broadcast %cst_28 : f32 to vector<1x4x2x128xf32>
      %c0_29 = arith.constant 0 : index
      %c0_30 = arith.constant 0 : index
      %c0_31 = arith.constant 0 : index
      %c0_32 = arith.constant 0 : index
      %37 = vector.load %arg5[%c0_29, %c0_30, %c0_31, %c0_32] : memref<1x4x2x128xf32, #tpu.memory_space<vmem>>, vector<1x4x2x128xf32>
      tpu.vector_store %arg5[%c0_29, %c0_30, %c0_31, %c0_32], %36 {strides = array<i32>} : memref<1x4x2x128xf32, #tpu.memory_space<vmem>>, vector<1x4x2x128xf32>,
      %cst_33 = arith.constant 0.000000e+00 : f32
      %38 = vector.broadcast %cst_33 : f32 to vector<1x4x2x128xf32>
      %c0_34 = arith.constant 0 : index
      %c0_35 = arith.constant 0 : index
      %c0_36 = arith.constant 0 : index
      %c0_37 = arith.constant 0 : index
      %39 = vector.load %arg6[%c0_34, %c0_35, %c0_36, %c0_37] : memref<1x4x2x128xf32, #tpu.memory_space<vmem>>, vector<1x4x2x128xf32>
      tpu.vector_store %arg6[%c0_34, %c0_35, %c0_36, %c0_37], %38 {strides = array<i32>} : memref<1x4x2x128xf32, #tpu.memory_space<vmem>>, vector<1x4x2x128xf32>,
    } else {
    }
    %c0 = arith.constant 0 : index
    %c0_1 = arith.constant 0 : index
    %c0_2 = arith.constant 0 : index
    %c0_3 = arith.constant 0 : index
    %3 = vector.load %arg3[%c0, %c0_1, %c0_2, %c0_3] : memref<1x4x2x128xf32, #tpu.memory_space<vmem>>, vector<1x4x2x128xf32>
    %4 = vector.shape_cast %3 : vector<1x4x2x128xf32> to vector<4x2x128xf32>
    %c0_4 = arith.constant 0 : index
    %c0_5 = arith.constant 0 : index
    %c0_6 = arith.constant 0 : index
    %c0_7 = arith.constant 0 : index
    %5 = vector.load %arg4[%c0_4, %c0_5, %c0_6, %c0_7] : memref<1x1x2x128xi32, #tpu.memory_space<vmem>>, vector<1x1x2x128xi32>
    %6 = vector.shape_cast %5 : vector<1x1x2x128xi32> to vector<2x128xi32>
    %cst = arith.constant dense<0xFF800000> : vector<2x128xf32>
    %7 = vector.multi_reduction <maximumf>, %4, %cst [0] : vector<4x2x128xf32> to vector<2x128xf32>
    %8 = vector.shape_cast %7 : vector<2x128xf32> to vector<1x2x128xf32>
    %9 = vector.broadcast %8 : vector<1x2x128xf32> to vector<4x2x128xf32>
    %10 = arith.subf %4, %9 : vector<4x2x128xf32>
    %11 = math.exp %10 : vector<4x2x128xf32>
    %cst_8 = arith.constant dense<0.000000e+00> : vector<2x128xf32>
    %12 = vector.multi_reduction <add>, %11, %cst_8 [0] : vector<4x2x128xf32> to vector<2x128xf32>
    %13 = vector.shape_cast %12 : vector<2x128xf32> to vector<1x2x128xf32>
    %14 = tpu.reciprocal %13 {approx = true} : vector<1x2x128xf32> -> vector<1x2x128xf32>
    %15 = vector.broadcast %14 : vector<1x2x128xf32> to vector<4x2x128xf32>
    %16 = arith.mulf %11, %15 : vector<4x2x128xf32>
    %17 = tpu.iota {dimensions = array<i32: 0>} : vector<4x2x128xi32>
    %18 = vector.shape_cast %6 : vector<2x128xi32> to vector<1x2x128xi32>
    %19 = vector.broadcast %18 : vector<1x2x128xi32> to vector<4x2x128xi32>
    %20 = arith.cmpi eq, %17, %19 : vector<4x2x128xi32>
    %cst_9 = arith.constant 0.000000e+00 : f32
    %21 = vector.broadcast %cst_9 : f32 to vector<4x2x128xf32>
    %22 = arith.select %20, %16, %21 : vector<4x2x128xi1>, vector<4x2x128xf32>
    %23 = arith.mulf %16, %16 : vector<4x2x128xf32>
    %cst_10 = arith.constant 1.000000e+00 : f32
    %cst_11 = arith.constant 0.000000e+00 : f32
    %24 = vector.broadcast %cst_10 : f32 to vector<4x2x128xf32>
    %25 = vector.broadcast %cst_11 : f32 to vector<4x2x128xf32>
    %26 = arith.select %20, %24, %25 : vector<4x2x128xi1>, vector<4x2x128xf32>
    %27 = arith.addf %23, %26 : vector<4x2x128xf32>
    %c0_12 = arith.constant 0 : index
    %c0_13 = arith.constant 0 : index
    %c0_14 = arith.constant 0 : index
    %c0_15 = arith.constant 0 : index
    %28 = vector.load %arg5[%c0_12, %c0_13, %c0_14, %c0_15] : memref<1x4x2x128xf32, #tpu.memory_space<vmem>>, vector<1x4x2x128xf32>
    %29 = vector.shape_cast %22 : vector<4x2x128xf32> to vector<1x4x2x128xf32>
    %30 = arith.addf %28, %29 : vector<1x4x2x128xf32>
    %c0_16 = arith.constant 0 : index
    %c0_17 = arith.constant 0 : index
    %c0_18 = arith.constant 0 : index
    %c0_19 = arith.constant 0 : index
    %31 = vector.load %arg5[%c0_16, %c0_17, %c0_18, %c0_19] : memref<1x4x2x128xf32, #tpu.memory_space<vmem>>, vector<1x4x2x128xf32>
    tpu.vector_store %arg5[%c0_16, %c0_17, %c0_18, %c0_19], %30 {strides = array<i32>} : memref<1x4x2x128xf32, #tpu.memory_space<vmem>>, vector<1x4x2x128xf32>,
    %c0_20 = arith.constant 0 : index
    %c0_21 = arith.constant 0 : index
    %c0_22 = arith.constant 0 : index
    %c0_23 = arith.constant 0 : index
    %32 = vector.load %arg6[%c0_20, %c0_21, %c0_22, %c0_23] : memref<1x4x2x128xf32, #tpu.memory_space<vmem>>, vector<1x4x2x128xf32>
    %33 = vector.shape_cast %27 : vector<4x2x128xf32> to vector<1x4x2x128xf32>
    %34 = arith.addf %32, %33 : vector<1x4x2x128xf32>
    %c0_24 = arith.constant 0 : index
    %c0_25 = arith.constant 0 : index
    %c0_26 = arith.constant 0 : index
    %c0_27 = arith.constant 0 : index
    %35 = vector.load %arg6[%c0_24, %c0_25, %c0_26, %c0_27] : memref<1x4x2x128xf32, #tpu.memory_space<vmem>>, vector<1x4x2x128xf32>
    tpu.vector_store %arg6[%c0_24, %c0_25, %c0_26, %c0_27], %34 {strides = array<i32>} : memref<1x4x2x128xf32, #tpu.memory_space<vmem>>, vector<1x4x2x128xf32>,
    return
  }
  func.func @transform_0(%arg0: i32, %arg1: i32, %arg2: i32) -> (i32, i32, i32, i32) {
    %c1_i32 = arith.constant 1 : i32
    %0 = arith.muli %arg1, %c1_i32 : i32
    %1 = arith.addi %0, %arg2 : i32
    %c0_i32 = arith.constant 0 : i32
    %c0_i32_0 = arith.constant 0 : i32
    %c0_i32_1 = arith.constant 0 : i32
    return %arg0, %c0_i32, %1, %c0_i32_0 : i32, i32, i32, i32
  }
  func.func @transform_1(%arg0: i32, %arg1: i32, %arg2: i32) -> (i32, i32, i32, i32) {
    %c1_i32 = arith.constant 1 : i32
    %0 = arith.muli %arg1, %c1_i32 : i32
    %1 = arith.addi %0, %arg2 : i32
    %c0_i32 = arith.constant 0 : i32
    %c0_i32_0 = arith.constant 0 : i32
    %c0_i32_1 = arith.constant 0 : i32
    return %arg0, %c0_i32, %1, %c0_i32_0 : i32, i32, i32, i32
  }
  func.func @transform_2(%arg0: i32, %arg1: i32, %arg2: i32) -> (i32, i32, i32, i32) {
    %c0_i32 = arith.constant 0 : i32
    %c0_i32_0 = arith.constant 0 : i32
    %c0_i32_1 = arith.constant 0 : i32
    return %arg0, %arg1, %c0_i32, %c0_i32_0 : i32, i32, i32, i32
  }
  func.func @transform_3(%arg0: i32, %arg1: i32, %arg2: i32) -> (i32, i32, i32, i32) {
    %c0_i32 = arith.constant 0 : i32
    %c0_i32_0 = arith.constant 0 : i32
    %c0_i32_1 = arith.constant 0 : i32
    return %arg0, %arg1, %c0_i32, %c0_i32_0 : i32, i32, i32, i32
  }
}

</mosaic_0001>

<bundles_post_ra>
// kernel: tpu_custom_call.1
= control target key start
LH: loop header
LB: loop body
LE: loop exit
PB: predicated region body
PF: predicated region fallthrough
CT: control target
= control target key end

     0   :  { %9 = vsyncpa [#allocation3], 0  ;;  %s1113_s0 = inlined_call_operand.hbm [shape: f32[2,4,2,128], index: 0, kind: input, shape index: {}]   ;;  %s1114_s1 = inlined_call_operand.hbm [shape: s32[2,1,2,128], index: 1, kind: input, shape index: {}]   ;;  %s1115_s2 = inlined_call_operand.hbm [shape: f32[2,4,2,128], index: 2, kind: output, shape index: {0}]   ;;  %s1116_s3 = inlined_call_operand.hbm [shape: f32[2,4,2,128], index: 3, kind: output, shape index: {1}]  }
   0x1   :  { %11 = vsyncpa [#allocation3 + $0x1], 0 }
   0x2   :  { %12 = vsyncpa [#allocation6], 0 }
   0x3   :  { %14 = vsyncpa [#allocation6 + $0x1], 0 }
   0x4   :  { %15 = vsyncpa [#allocation4], 0 }
   0x5   :  { %17 = vsyncpa [#allocation4 + $0x1], 0 }
   0x6   :  { %18 = vsyncpa [#allocation9], 0 }
   0x7   :  { %20 = vsyncpa [#allocation9 + $0x1], 0  ;;  %s883_s12 = smov 0   ;;  %s885_s13 = smov 0  }
   0x8   :  { %s887_s14 = smov 0   ;;  %s889_s15 = smov 0  }
   0x9   :  { %s891_s16 = smov 0   ;;  %s893_s17 = smov 0  }
   0xa LB: > { %s566_s18 = sadd.s32 4294967295, %s856_s17   ;;  %s567_s19 = sadd.s32 4294967294, %s856_s17   ;;  %s856_s17 = sphi %s893_s17, %s26_s17   ;;  %s852_s16 = sphi %s891_s16, %s1126_s16   ;;  %s848_s15 = sphi %s889_s15, %s1125_s15   ;;  %s844_s14 = sphi %s887_s14, %s1124_s14   ;;  %s840_s13 = sphi %s885_s13, %s1123_s13   ;;  %s836_s12 = sphi %s883_s12, %s1122_s12  }
   0xb   : > { %s45_s20 = sadd.s32 1, %s852_s16  ;;  %s56_s21 = sadd.s32 1, %s844_s14 }
   0xc   : > { %p47_p0 = scmp.ge.s32.totalorder %s45_s20, 2  ;;  %p63_p1 = scmp.ne.s32.totalorder %s844_s14, %s840_s13 }
   0xd   : > { %p64_p2 = scmp.eq.s32.totalorder %s856_s17, 0  ;;  %p69_p3 = scmp.ne.s32.totalorder %s840_s13, %s836_s12 }
   0xe   : > { %s1128_s20 = smov (%p47_p0, %s45_s20), 0  ;;  %p70_p5 = scmp.eq.s32.totalorder %s566_s18, 0 }
   0xf   : > { %p924_p4 = por %p64_p2, %p63_p1  ;;  %s51_s23 = ssub.s32 %s852_s16, %s1128_s20 }
  0x10   : > { %p125_p6 = scmp.eq.s32.totalorder %s566_s18, 1  ;;  %p54_p7 = scmp.eq.s32.totalorder %s51_s23, 0 }
  0x11   : > { %p930_p8 = por %p70_p5, %p69_p3  ;;  %p131_p10 = scmp.eq.s32.totalorder %s567_s19, 1 }
  0x12   : > { %p934_p9 = por %p125_p6, %p63_p1  ;;  %p569_p12 = scmp.ge.s32.totalorder %s856_s17, 2 }
  0x13   : > { %s939_s26 = scalar_select %p54_p7, %s844_s14, %s56_s21  }
  0x14   : > { %p941_p11 = por %p131_p10, %p69_p3  ;;  %p613_p13 = scmp.lt.s32.totalorder %s856_s17, 2 }
  0x15   : > { %s179_s28 = sand.u32 1, %s844_s14   ;;  %s588_s30 = sshll.u32 %s852_s16, 3 }
  0x16   : > { %s570_s29 = sshll.u32 %s179_s28, 3  ;;  %s190_s6 = scalar_lea.hbm %s1113_s0, %s588_s30 }
  0x17   : > { %s183_s7 = scalar_lea.vmem [#allocation2], %s570_s29  ;;  %s191_s9 = sshll.u32 %s190_s6, 4  ;;  %s192_s9 = int_to_ptr.hbm [resolvable:$true] %s191_s9 }
  0x18   : > { %s193_s8 = sshll.u32 %s183_s7, 4  ;;  %p954_p0 = pnand %p613_p13, %p924_p4  ;;  %s194_s8 = int_to_ptr.vmem [resolvable:$true] %s193_s8 }
  0x19   : > { %p575_p1 = scmp.ge.s32.totalorder %s856_s17, 1  ;;  %s180_s11 = scalar_lea.sflag [#allocation3], %s179_s28 }
  0x1a   : > { %s858_s18 = smov 32   ;;  %s859_s19 = smov 2  }
  0x1b   : > { %602 = dma.hbm_to_vmem [thread:$0]  (!%p954_p0), %s192_s9, 128, %s194_s8, %s180_s11, %s858_s18, %s858_s18, %s859_s19  }
  0x1c   : > { %p222_p2 = scmp.lt.s32.totalorder %s856_s17, 3  ;;  %s573_s21 = sshll.u32 %s179_s28, 1 }
  0x1d   : > { %s574_s23 = sshll.u32 %s852_s16, 1  ;;  %s207_s4 = scalar_lea.vmem [#allocation5], %s573_s21 }
  0x1e   : > { %p223_p3 = pnand %p575_p1, %p222_p2  ;;  %s213_s22 = scalar_lea.hbm %s1114_s1, %s574_s23 }
  0x1f   : > { %s217_s5 = sshll.u32 %s207_s4, 4  ;;  %s215_s6 = sshll.u32 %s213_s22, 4  ;;  %s218_s5 = int_to_ptr.vmem [resolvable:$true] %s217_s5  ;;  %s216_s6 = int_to_ptr.hbm [resolvable:$true] %s215_s6 }
  0x20   : > { %s204_s7 = scalar_lea.sflag [#allocation6], %s179_s28  ;;  %226 = sbr.rel (%p223_p3) target bundleno = 99 (0x63), region = 28 }
  0x21   : > { %605 = dma.hbm_to_vmem [thread:$0]  (!%p954_p0), %s216_s6, 32, %s218_s5, %s204_s7  }
  0x22   : > { %s969_s8 = sand.u32 (!%p223_p3), 1, %s840_s13  }
  0x23   : > { %s576_s9 = sshll.u32 (!%p223_p3), %s969_s8, 3  ;;  %s229_s11 = scalar_lea.sflag (!%p223_p3), [#allocation3], %s969_s8 }
  0x24   : > { %s232_s18 = scalar_lea.vmem (!%p223_p3), [#allocation2], %s576_s9 }
  0x25   : > { %819 = dma.done.wait (%p930_p8), %s229_s11, 128  }
  0x26   : > { %821 = vsyncadd (%p930_p8), %s229_s11, 4294967168  ;;  %s577_s28 = sshll.u32 %s969_s8, 1  ;;  %s239_s10 = scalar_lea.sflag [#allocation6], %s969_s8 }
  0x27   : > { %s979_s19 = scalar_lea.vmem [#allocation5], %s577_s28 }
  0x28   : > { %823 = dma.done.wait (%p930_p8), %s239_s10, 32  }
  0x29   : > { %825 = vsyncadd (%p930_p8), %s239_s10, 4294967264  ;;  %s985_s21 = scalar_lea.vmem [#allocation7], %s576_s9  ;;  %v860_v0 = vmov 0.0   ;;  %s995_s23 = scalar_lea.vmem [#allocation8], %s576_s9  ;;  %vm297_vm0 = vcmask 1041408  }
  0x2a   : > { %284 = vst [vmem:[%s985_s21] sm:$0x3] %v860_v0  ;;  %v292_v1 = vld [vmem:[%s232_s18] sm:$0x3]  ;;  %v293_v2 = vld [vmem:[%s232_s18 + $0x2] sm:$0x3]  ;;  %s589_s24 = sshll.u32 %s848_s15, 3 }
  0x2b   : > { %285 = vst [vmem:[%s985_s21 + $0x2] sm:$0x3] %v860_v0  ;;  %v294_v3 = vld [vmem:[%s232_s18 + $0x4] sm:$0x3]  ;;  %v295_v4 = vld [vmem:[%s232_s18 + $0x6] sm:$0x3]  ;;  %s1021_s22 = scalar_lea.hbm %s1115_s2, %s589_s24  ;;  %s1053_s9 = scalar_lea.hbm %s1116_s3, %s589_s24 }
  0x2c   : > { %286 = vst [vmem:[%s985_s21 + $0x4] sm:$0x3] %v860_v0  ;;  %v298_v5 = vsel %vm297_vm0, %v292_v1, -inf  ;;  %v299_v6 = vsel %vm297_vm0, %v293_v2, -inf  ;;  %v300_v7 = vsel %vm297_vm0, %v294_v3, -inf  ;;  %v301_v8 = vsel %vm297_vm0, %v295_v4, -inf }
  0x2d   : > { %287 = vst [vmem:[%s985_s21 + $0x6] sm:$0x3] %v860_v0  ;;  %v302_v9 = vmax.f32 %v298_v5, %v299_v6  ;;  %v303_v10 = vmax.f32 %v300_v7, %v301_v8  ;;  %v296_v31 = vld [vmem:[%s979_s19] sm:$0x3]  ;;  %s393_s4 = sshll.u32 %s985_s21, 4  ;;  %s395_s5 = sshll.u32 %s1021_s22, 4  ;;  %s1041_s4 = int_to_ptr.vmem [resolvable:$true] %s393_s4  ;;  %s1046_s5 = int_to_ptr.hbm [resolvable:$true] %s395_s5 }
  0x2e   : > { %288 = vst [vmem:[%s995_s23] sm:$0x3] %v860_v0  ;;  %vm329_vm1 = vcmp.eq.s32.totalorder %v296_v31, 0  ;;  %vm330_vm2 = vcmp.eq.s32.totalorder %v296_v31, 1  ;;  %vm331_vm3 = vcmp.eq.s32.totalorder %v296_v31, 2  ;;  %vm332_vm4 = vcmp.eq.s32.totalorder %v296_v31, 3  ;;  %s412_s15 = sshll.u32 %s995_s23, 4  ;;  %s413_s15 = int_to_ptr.vmem [resolvable:$true] %s412_s15 }
  0x2f   : > { %289 = vst [vmem:[%s995_s23 + $0x2] sm:$0x3] %v860_v0  ;;  %v304_v11 = vmax.f32 %v302_v9, %v303_v10  ;;  %v341_v41 = vsel %vm329_vm1, 1.0, %v860_v0  ;;  %v342_v42 = vsel %vm330_vm2, 1.0, %v860_v0  ;;  %v343_v43 = vsel %vm331_vm3, 1.0, %v860_v0  ;;  %s414_s11 = sshll.u32 %s1053_s9, 4  ;;  %s415_s11 = int_to_ptr.hbm [resolvable:$true] %s414_s11 }
  0x30   : > { %290 = vst [vmem:[%s995_s23 + $0x4] sm:$0x3] %v860_v0  ;;  %v344_v44 = vsel %vm332_vm4, 1.0, %v860_v0  ;;  %s374_s18 = scalar_lea.sflag [#allocation4], %s969_s8  ;;  %s752_s28 = sshra.s32 %s1046_s5, 4  ;;  %s753_s28 = int_to_ptr.hbm [resolvable:$true] %s752_s28 }
  0x31   : > { %291 = vst [vmem:[%s995_s23 + $0x6] sm:$0x3] %v860_v0  ;;  %v305_v12 = vsub.f32 %v292_v1, %v304_v11  ;;  %v306_v13 = vsub.f32 %v293_v2, %v304_v11  ;;  %v307_v14 = vsub.f32 %v294_v3, %v304_v11  ;;  %v308_v15 = vsub.f32 %v295_v4, %v304_v11  ;;  %v349_v33 = vld [vmem:[%s985_s21] sm:$0x3]  ;;  %s754_s10 = scalar_lea.hbm %s753_s28, 8  ;;  %s758_s29 = scalar_lea.hbm %s1115_s2, 16 }
  0x32   : > { %v350_v36 = vld [vmem:[%s985_s21 + $0x2] sm:$0x3]  ;;  %p755_p4 = scmp.ne.s32.totalorder %s753_s28, %s754_s10  ;;  %p759_p7 = scmp.lt.s32.totalorder %s753_s28, %s1115_s2 }
  0x33   : > { %v309_v16 = vmul.f32 1.442695, %v305_v12  ;;  %v311_v17 = vmul.f32 1.442695, %v306_v13  ;;  %v313_v18 = vmul.f32 1.442695, %v307_v14  ;;  %p760_p8 = scmp.lt.s32.totalorder %s758_s29, %s754_s10 }
  0x34   : > { %v315_v19 = vmul.f32 1.442695, %v308_v15  ;;  %v351_v38 = vld [vmem:[%s985_s21 + $0x4] sm:$0x3]  ;;  %v352_v40 = vld [vmem:[%s985_s21 + $0x6] sm:$0x3]  ;;  %p756_p5 = pnand %p755_p4, %p934_p9 }
  0x35   : > { %668 = vpow2.f32 %v309_v16  ;;  %v361_v54 = vld [vmem:[%s995_s23] sm:$0x3]  ;;  %p761_p10 = por %p760_p8, %p759_p7 }
  0x36   : > { %670 = vpow2.f32 %v311_v17  ;;  %v362_v58 = vld [vmem:[%s995_s23 + $0x2] sm:$0x3]  ;;  %p757_p6 = pneg %p756_p5 }
  0x37   : > { %672 = vpow2.f32 %v313_v18  ;;  %v363_v59 = vld [vmem:[%s995_s23 + $0x4] sm:$0x3] }
  0x38   : > { %674 = vpow2.f32 %v315_v19  ;;  %v364_v0 = vld [vmem:[%s995_s23 + $0x6] sm:$0x3]  ;;  %p762_p13 = pnand %p761_p10, %p757_p6 }
  0x3b   : > { %v669_v20 = vpop.eup %668 }
  0x3c   : > { %v671_v21 = vpop.eup %670  ;;  %v317_v22 = vsel %vm297_vm0, %v669_v20, 0.0 }
  0x3d   : > { %v673_v23 = vpop.eup %672  ;;  %v318_v24 = vsel %vm297_vm0, %v671_v21, 0.0 }
  0x3e   : > { %v675_v25 = vpop.eup %674  ;;  %v319_v26 = vadd.f32 %v318_v24, %v317_v22  ;;  %v320_v27 = vsel %vm297_vm0, %v673_v23, 0.0 }
  0x3f   : > { %v322_v28 = vsel %vm297_vm0, %v675_v25, 0.0 }
  0x40   : > { %v321_v29 = vadd.f32 %v320_v27, %v319_v26 }
  0x42   : > { %v323_v30 = vadd.f32 %v322_v28, %v321_v29 }
  0x44   : > { %676 = vrcp.f32 %v323_v30 }
  0x4a   : > { %v677_v32 = vpop.eup %676 }
  0x4b   : > { %v325_v34 = vmul.f32 %v677_v32, %v669_v20  ;;  %v326_v35 = vmul.f32 %v677_v32, %v671_v21  ;;  %v327_v37 = vmul.f32 %v677_v32, %v673_v23  ;;  %v328_v39 = vmul.f32 %v677_v32, %v675_v25 }
  0x4d   : > { %v333_v45 = vsel %vm329_vm1, %v325_v34, 0.0  ;;  %v334_v46 = vsel %vm330_vm2, %v326_v35, 0.0  ;;  %v335_v47 = vsel %vm331_vm3, %v327_v37, 0.0  ;;  %v336_v48 = vsel %vm332_vm4, %v328_v39, 0.0 }
  0x4e   : > { %v353_v49 = vadd.f32 %v349_v33, %v333_v45  ;;  %v354_v50 = vadd.f32 %v350_v36, %v334_v46  ;;  %v355_v51 = vadd.f32 %v351_v38, %v335_v47  ;;  %v356_v52 = vadd.f32 %v352_v40, %v336_v48 }
  0x4f   : > { %v337_v53 = vmul.f32 %v325_v34, %v325_v34  ;;  %v338_v55 = vmul.f32 %v326_v35, %v326_v35  ;;  %v339_v56 = vmul.f32 %v327_v37, %v327_v37  ;;  %v340_v57 = vmul.f32 %v328_v39, %v328_v39 }
  0x50   : > { %357 = vst [vmem:[%s985_s21] sm:$0x3] %v353_v49 }
  0x51   : > { %358 = vst [vmem:[%s985_s21 + $0x2] sm:$0x3] %v354_v50  ;;  %v345_v60 = vadd.f32 %v341_v41, %v337_v53  ;;  %v346_v61 = vadd.f32 %v342_v42, %v338_v55  ;;  %v347_v62 = vadd.f32 %v343_v43, %v339_v56  ;;  %v348_v63 = vadd.f32 %v344_v44, %v340_v57 }
  0x52   : > { %359 = vst [vmem:[%s985_s21 + $0x4] sm:$0x3] %v355_v51 }
  0x53   : > { %360 = vst [vmem:[%s985_s21 + $0x6] sm:$0x3] %v356_v52  ;;  %v365_v1 = vadd.f32 %v361_v54, %v345_v60  ;;  %v366_v2 = vadd.f32 %v362_v58, %v346_v61  ;;  %v367_v3 = vadd.f32 %v363_v59, %v347_v62  ;;  %v368_v4 = vadd.f32 %v364_v0, %v348_v63 }
  0x54   : > { %765 = shalt.err (!%p762_p13)
}
  0x55   : > { %s861_s22 = smov 32   ;;  %s862_s6 = smov 2   ;;  %369 = vst [vmem:[%s995_s23] sm:$0x3] %v365_v1 }
  0x56   : > { %595 = dma.vmem_to_hbm [thread:$0]  (%p934_p9), %s1041_s4, 128, %s1046_s5, %s374_s18, %s861_s22, %s861_s22, %s862_s6  }
  0x57   : > { %370 = vst [vmem:[%s995_s23 + $0x2] sm:$0x3] %v366_v2  ;;  %s379_s7 = scalar_lea.sflag [#allocation9], %s969_s8  ;;  %s780_s9 = sshra.s32 %s415_s11, 4  ;;  %s781_s9 = int_to_ptr.hbm [resolvable:$true] %s780_s9 }
  0x58   : > { %371 = vst [vmem:[%s995_s23 + $0x4] sm:$0x3] %v367_v3  ;;  %s782_s28 = scalar_lea.hbm %s781_s9, 8  ;;  %s786_s24 = scalar_lea.hbm %s1116_s3, 16 }
  0x59   : > { %372 = vst [vmem:[%s995_s23 + $0x6] sm:$0x3] %v368_v4  ;;  %p783_p0 = scmp.ne.s32.totalorder %s781_s9, %s782_s28  ;;  %p787_p3 = scmp.lt.s32.totalorder %s781_s9, %s1116_s3 }
  0x5a   : > { %p788_p4 = scmp.lt.s32.totalorder %s786_s24, %s782_s28 }
  0x5b   : > { %p784_p1 = pnand %p783_p0, %p934_p9 }
  0x5c   : > { %p789_p5 = por %p788_p4, %p787_p3 }
  0x5d   : > { %p785_p2 = pneg %p784_p1 }
  0x5f   : > { %p790_p6 = pnand %p789_p5, %p785_p2 }
  0x61   : > { %793 = shalt.err (!%p790_p6)
}
  0x62   : > { %596 = dma.vmem_to_hbm [thread:$0]  (%p934_p9), %s413_s15, 128, %s415_s11, %s379_s7, %s861_s22, %s861_s22, %s862_s6  }
  0x63 PF: > { %s429_s8 = sand.u32 1, %s836_s12   ;;  %p607_p7 = pnand %p569_p12, %p941_p11 }
  0x64   : > { %s430_s23 = scalar_lea.sflag [#allocation4], %s429_s8 }
  0x65   : > { %p608_p8 = pneg %p607_p7 }
  0x67   : > { %827 = dma.done.wait (%p608_p8), %s430_s23, 128  }
  0x68   : > { %829 = vsyncadd (%p608_p8), %s430_s23, 4294967168  ;;  %s440_s5 = scalar_lea.sflag [#allocation9], %s429_s8 }
  0x69   : > { %831 = dma.done.wait (%p608_p8), %s440_s5, 128  }
  0x6a   : > { %833 = vsyncadd (%p608_p8), %s440_s5, 4294967168  ;;  %s26_s17 = sadd.s32 1, %s856_s17   ;;  %s1122_s12 = smov %s840_s13 }
  0x6b   : > { %p23_p10 = scmp.ge.s32.totalorder %s26_s17, 4   ;;  %s1123_s13 = smov %s844_s14 }
  0x6c   : > { %s1124_s14 = smov %s939_s26  ;;  %s1125_s15 = smov %s852_s16 }
  0x6d   : > { %s1126_s16 = smov %s1128_s20  ;;  %25 = sbr.rel (!%p23_p10) target bundleno = 10 (0xa), region = 107 }
  0x72   :  { %446 = vsyncpa [#allocation3], 1 }
  0x73   :  { %448 = vsyncpa [#allocation3 + $0x1], 1 }
  0x74   :  { %449 = vsyncpa [#allocation6], 1 }
  0x75   :  { %451 = vsyncpa [#allocation6 + $0x1], 1 }
  0x76   :  { %452 = vsyncpa [#allocation4], 1 }
  0x77   :  { %454 = vsyncpa [#allocation4 + $0x1], 1 }
  0x78   :  { %455 = vsyncpa [#allocation9], 1 }
  0x79   :  { %457 = vsyncpa [#allocation9 + $0x1], 1 }

</bundles_post_ra>
